<compile_context>
chip_gen: v7x
topology: tpu7x:2x2x1
jax: 0.10.0
libtpu: 0.0.40
codegen_flags: <defaults>
</compile_context>

<pallas_src>
import jax
import jax.numpy as jnp
from jax.experimental import pallas as pl
from jax.experimental.pallas import tpu as pltpu

IN_DIM = 8      # network input features
OUT_DIM = 8     # network output features
LANE = 128      # lane-dense padded output width


def affine_kernel(x_ref, w_ref, b_ref, o_ref):
    # One MXU matmul + bias add; output tile is a full 128-lane slab.
    o_ref[...] = (
        jnp.dot(x_ref[...], w_ref[...], preferred_element_type=jnp.float32)
        + b_ref[...]
    ).astype(o_ref.dtype)


def collapse_params(params):
    """Fold the activation-free 4-layer chain into one (8, 8) affine map and
    zero-pad the output features to a 128-lane width (lane-dense stores)."""
    w_eff = params["w1"] @ params["w2"] @ params["w3"] @ params["w4"]      # (8, 8)
    b_eff = ((params["b1"] @ params["w2"] + params["b2"]) @ params["w3"]
             + params["b3"]) @ params["w4"] + params["b4"]                 # (1, 8)
    w_eff_pad = jnp.zeros((IN_DIM, LANE), jnp.float32).at[:, :OUT_DIM].set(w_eff)
    b_eff_pad = jnp.zeros((1, LANE), jnp.float32).at[:, :OUT_DIM].set(b_eff)
    return w_eff_pad, b_eff_pad


def _round_up(n, m):
    return (n + m - 1) // m * m


def mlp_forward(x, params):
    """Forward pass equivalent to layer_4(layer_3(layer_2(layer_1(x))))."""
    w_eff_pad, b_eff_pad = collapse_params(params)

    B = x.shape[0]
    # Batch tiling: small batches -> one tile (rounded up to a multiple of 8);
    # large batches -> 512-row tiles.  512 x 128 x 4 B x 2 buffers per operand
    # is tiny, well within v7x's 64 MiB VMEM (and the 32 MiB default scope).
    TB = 512
    if B <= TB:
        tb = max(8, _round_up(B, 8))
        bp = tb
    else:
        tb = TB
        bp = _round_up(B, TB)

    if bp != B:
        x = jnp.pad(x, ((0, bp - B), (0, 0)))

    grid = (bp // tb,)

    out_padded = pl.pallas_call(
        affine_kernel,
        out_shape=jax.ShapeDtypeStruct((bp, LANE), jnp.float32),
        grid=grid,
        in_specs=[
            pl.BlockSpec((tb, IN_DIM), lambda i: (i, 0)),     # activation tiles
            pl.BlockSpec((IN_DIM, LANE), lambda i: (0, 0)),   # resident weights
            pl.BlockSpec((1, LANE), lambda i: (0, 0)),        # resident bias
        ],
        out_specs=pl.BlockSpec((tb, LANE), lambda i: (i, 0)),
        compiler_params=pltpu.CompilerParams(
            dimension_semantics=("parallel",)),
    )(x, w_eff_pad, b_eff_pad)

    # Strip batch padding and the zero-padded output lanes.
    return out_padded[:B, :OUT_DIM]


def init_params(key):
    """Deterministic init matching nn.Linear's default U(-1/sqrt(fan_in), +...)."""
    dims = [8, 41, 49, 41, 8]
    params = {}
    keys = jax.random.split(key, 8)
    for i in range(4):
        fan_in, fan_out = dims[i], dims[i + 1]
        bound = 1.0 / (fan_in ** 0.5)
        # stored as (in, out) so the forward pass is x @ W + b
        w = jax.random.uniform(keys[2 * i], (fan_in, fan_out),
                               minval=-bound, maxval=bound, dtype=jnp.float32)
        b = jax.random.uniform(keys[2 * i + 1], (1, fan_out),
                               minval=-bound, maxval=bound, dtype=jnp.float32)
        params[f"w{i + 1}"] = w
        params[f"b{i + 1}"] = b
    return params


if __name__ == "__main__":
    key = jax.random.PRNGKey(0)
    pkey, xkey = jax.random.split(key)

    params = init_params(pkey)
    batch = 11  # non-multiple of 8 to exercise the batch-padding path
    x = jax.random.normal(xkey, (batch, IN_DIM), dtype=jnp.float32)

    out = mlp_forward(x, params)
    out = jax.block_until_ready(out)

    # Reference: the original chained 4-layer forward in plain JAX.
    ref = x
    for i in range(1, 5):
        ref = ref @ params[f"w{i}"] + params[f"b{i}"]

    assert out.shape == (batch, OUT_DIM)
    # Slightly loose tolerance: the kernel uses the (mathematically identical)
    # collapsed W_eff/b_eff, which reassociates the f32 matmul chain.
    assert jnp.allclose(out, ref, atol=1e-4, rtol=1e-4)

    print("KERNEL_OK")
</pallas_src>

<mosaic_0001>
module attributes {stable_mosaic.version = 11 : i64} {
  func.func @affine_kernel(%arg0: i32, %arg1: memref<16x8xf32, #tpu.memory_space<vmem>>, %arg2: memref<8x128xf32, #tpu.memory_space<vmem>>, %arg3: memref<1x128xf32, #tpu.memory_space<vmem>>, %arg4: memref<16x128xf32, #tpu.memory_space<vmem>>) attributes {dimension_semantics = [#tpu.dimension_semantics<parallel>], iteration_bounds = array<i64: 1>, scalar_prefetch = 0 : i64, scratch_operands = 0 : i64, tpu.core_type = #tpu.core_type<tc>, window_params = [{transform_indices = @transform_0, window_bounds = array<i64: 16, 8>}, {pipeline_mode = #tpu.pipeline_mode<synchronous>, transform_indices = @transform_1, window_bounds = array<i64: 8, 128>}, {pipeline_mode = #tpu.pipeline_mode<synchronous>, transform_indices = @transform_2, window_bounds = array<i64: 1, 128>}, {transform_indices = @transform_3, window_bounds = array<i64: 16, 128>}]} {
    %c0 = arith.constant 0 : index
    %c0_0 = arith.constant 0 : index
    %0 = vector.load %arg1[%c0, %c0_0] : memref<16x8xf32, #tpu.memory_space<vmem>>, vector<16x8xf32>
    %c0_1 = arith.constant 0 : index
    %c0_2 = arith.constant 0 : index
    %1 = vector.load %arg2[%c0_1, %c0_2] : memref<8x128xf32, #tpu.memory_space<vmem>>, vector<8x128xf32>
    %cst = arith.constant dense<0.000000e+00> : vector<16x128xf32>
    %2 = tpu.matmul %0, %1, %cst {dimension_numbers = #tpu.dot_dimension_numbers<[1], [0], [0], [1], [0, 0, 1, 1], [], []>} : vector<16x8xf32>, vector<8x128xf32>, vector<16x128xf32> -> vector<16x128xf32>
    %c0_3 = arith.constant 0 : index
    %c0_4 = arith.constant 0 : index
    %3 = vector.load %arg3[%c0_3, %c0_4] : memref<1x128xf32, #tpu.memory_space<vmem>>, vector<1x128xf32>
    %4 = vector.broadcast %3 : vector<1x128xf32> to vector<16x128xf32>
    %5 = arith.addf %2, %4 : vector<16x128xf32>
    %c0_5 = arith.constant 0 : index
    %c0_6 = arith.constant 0 : index
    %6 = vector.load %arg4[%c0_5, %c0_6] : memref<16x128xf32, #tpu.memory_space<vmem>>, vector<16x128xf32>
    tpu.vector_store %arg4[%c0_5, %c0_6], %5 {strides = array<i32>} : memref<16x128xf32, #tpu.memory_space<vmem>>, vector<16x128xf32>,
    return
  }
  func.func @transform_0(%arg0: i32) -> (i32, i32) {
    %c0_i32 = arith.constant 0 : i32
    %c0_i32_0 = arith.constant 0 : i32
    return %arg0, %c0_i32 : i32, i32
  }
  func.func @transform_1(%arg0: i32) -> (i32, i32) {
    %c0_i32 = arith.constant 0 : i32
    %c0_i32_0 = arith.constant 0 : i32
    %c0_i32_1 = arith.constant 0 : i32
    return %c0_i32, %c0_i32_0 : i32, i32
  }
  func.func @transform_2(%arg0: i32) -> (i32, i32) {
    %c0_i32 = arith.constant 0 : i32
    %c0_i32_0 = arith.constant 0 : i32
    %c0_i32_1 = arith.constant 0 : i32
    return %c0_i32, %c0_i32_0 : i32, i32
  }
  func.func @transform_3(%arg0: i32) -> (i32, i32) {
    %c0_i32 = arith.constant 0 : i32
    %c0_i32_0 = arith.constant 0 : i32
    return %arg0, %c0_i32 : i32, i32
  }
}

</mosaic_0001>

<bundles_post_ra>
// kernel: tpu_custom_call.1
= control target key start
LH: loop header
LB: loop body
LE: loop exit
PB: predicated region body
PF: predicated region fallthrough
CT: control target
= control target key end

     0   :  { %vm25_vm0 = vcmask 64512   ;;  %s210_s0 = inlined_call_operand.vmem [shape: f32[16,8], index: 0, kind: input, shape index: {}]   ;;  %s211_s1 = inlined_call_operand.vmem [shape: f32[8,128], index: 1, kind: input, shape index: {}]   ;;  %s212_s2 = inlined_call_operand.vmem [shape: f32[1,128], index: 2, kind: input, shape index: {}]   ;;  %s213_s3 = inlined_call_operand.hbm [shape: f32[16,128], index: 3, kind: output, shape index: {}]  }
   0x1   :  { %v17_v0 = vld [vmem:[%s211_s1] sm:$0xff]  ;;  %v16_v2 = vld [vmem:[%s210_s0 + $0x8] sm:$0xff] }
   0x2   :  { %v15_v1 = vld [vmem:[%s210_s0] sm:$0xff]  ;;  %131 = vmatprep.subr.mxu0 %v17_v0 }
   0x3   :  { %133 = vmatprep.mubr.msk.f32.mxu0 %vm25_vm0, %v15_v1 }
   0x4   :  { %8 = vsyncpa [#allocation3], 0  ;;  %132 = vmatpush3.msra.mxu0 %v17_v0  ;;  %v125_v3 = vld [vmem:[%s212_s2] ss:$0 sm:$0xff]  ;;  %s163_s20 = smov [#allocation2]  }
   0x5   :  { %134 = vmatmul.mubr.msk.f32.vlgmr.msra.gmra.mrb[0].mxu0 %vm25_vm0, %v16_v2  ;;  %s114_s1 = sshll.u32 %s163_s20, 4  ;;  %s115_s1 = int_to_ptr.vmem [resolvable:$true] %s114_s1 }
   0x6   :  { %s139_s21 = scalar_lea.vmem %s115_s1, 256  ;;  %p144_p1 = scmp.lt.s32.totalorder %s115_s1, %s115_s1 }
   0x7   :  { %p140_p0 = scmp.ne.s32.totalorder %s115_s1, %s139_s21  ;;  %p145_p2 = scmp.lt.s32.totalorder %s139_s21, %s139_s21 }
   0x9   :  { %p146_p3 = por %p145_p2, %p144_p1 }
   0xb   :  { %p147_p4 = pnand %p146_p3, %p140_p0 }
  0xd8   :  { %v135_v4 = vpop.f32.mrb[0].mxu0 }
  0xd9   :  { %v104_v5 = vadd.f32 %v135_v4, %v125_v3  ;;  %v98_v6 = vpop.f32.mrb[1].mxu0 }
  0xda   :  { %v99_v7 = vadd.f32 %v125_v3, %v98_v6 }
  0xdb   :  { %108 = vst [vmem:[#allocation2 + $0x8] sm:$0xff] %v104_v5 }
  0xdc   :  { %107 = vst [vmem:[#allocation2] sm:$0xff] %v99_v7 }
  0xdd   :  { %150 = shalt.err (!%p147_p4)
}
  0xde   :  { %s151_s2 = scalar_lea.hbm %s213_s3, 256 }
  0xdf   :  { %p152_p5 = scmp.ne.s32.totalorder %s213_s3, %s151_s2  ;;  %p155_p6 = scmp.lt.u32.totalorder %s151_s2, %s213_s3 }
  0xe1   :  { %p157_p7 = pnand %p155_p6, %p152_p5 }
  0xe3   :  { %160 = shalt.err (!%p157_p7)
}
  0xe4   :  { %s164_s27 = smov 128   ;;  %s165_s28 = smov 8  }
  0xe5   :  { %120 = dma.vmem_to_hbm [thread:$0]  %s115_s1, 256, %s213_s3, [#allocation3], %s164_s27, %s164_s27, %s165_s28  }
  0xe6   :  { %161 = dma.done.wait [#allocation3], 256  }
  0xe7   :  { %162 = vsyncadd [#allocation3], 4294967040 }
  0xe8   :  { %124 = vsyncpa [#allocation3], 1 }

</bundles_post_ra>
